<compile_context>
chip_gen: v5e
topology: v5e:2x2
jax: 0.10.0
libtpu: 0.0.40
codegen_flags: <defaults>
</compile_context>

<pallas_src>
import functools
import math

import jax
import jax.numpy as jnp
from jax.experimental import pallas as pl
from jax.experimental.pallas import tpu as pltpu

EPS = 1e-5  # nn.InstanceNorm2d default eps


def _resblock_kernel(x_ref, w1_ref, b1_ref, w2_ref, b2_ref, o_ref, *, H, W):
    # x_ref : (R, HW)      R = samples_per_block * C rows, flat spatial on lanes
    # w*_ref: (R, 9*R)     block-diagonal, tap-flattened conv weights
    # b*_ref: (R, 1)       conv biases (replicated per sample)
    # o_ref : (R, HW)
    R, HW = x_ref.shape
    x = x_ref[...]  # (R, HW) float32

    # ---- per-tap shifts + (1, HW) boundary masks (lane-only, broadcast) ----
    lane = jax.lax.broadcasted_iota(jnp.int32, (1, HW), 1)
    if W & (W - 1) == 0:            # power-of-two fast path
        col = lane & (W - 1)
    else:
        col = lane % W

    taps = []
    for kh in range(3):
        for kw in range(3):
            dh, dw = kh - 1, kw - 1
            # roll so that shifted[i] == x[i + dh*W + dw]
            shift = (-(dh * W + dw)) % HW
            conds = []
            if dh == -1:
                conds.append(lane >= W)          # h - 1 >= 0
            elif dh == 1:
                conds.append(lane < HW - W)      # h + 1 <  H
            if dw == -1:
                conds.append(col >= 1)           # w - 1 >= 0
            elif dw == 1:
                conds.append(col < W - 1)        # w + 1 <  W
            mask = None
            for c in conds:
                mask = c if mask is None else (mask & c)
            taps.append((shift, mask))

    def conv3x3(src, w_ref, b_ref):
        # 3x3 "same" zero-padded conv (block-diagonal over packed samples):
        # stack the 9 rolled+masked copies along the contraction axis and do
        # ONE (R, 9R) x (9R, HW) MXU dot.
        parts = []
        for shift, mask in taps:
            shifted = src if shift == 0 else pltpu.roll(src, shift, axis=1)
            if mask is not None:
                shifted = jnp.where(mask, shifted, 0.0)   # zero padding
            parts.append(shifted)
        stacked = jnp.concatenate(parts, axis=0)          # (9*R, HW)
        return jnp.dot(w_ref[...], stacked,
                       preferred_element_type=jnp.float32) + b_ref[...]

    def instance_norm(y):
        # Per-(sample, channel) stats over HW in a single fused pass.
        mean = jnp.mean(y, axis=1, keepdims=True)
        mean_sq = jnp.mean(y * y, axis=1, keepdims=True)
        var = mean_sq - mean * mean                       # biased variance
        return (y - mean) * jax.lax.rsqrt(var + EPS)

    # ---- Conv2dBlock #1: conv -> instance norm -> relu ----
    y1 = jnp.maximum(instance_norm(conv3x3(x, w1_ref, b1_ref)), 0.0)
    # ---- Conv2dBlock #2: conv -> instance norm (no activation) ----
    y2 = instance_norm(conv3x3(y1, w2_ref, b2_ref))
    # ---- residual add ----
    o_ref[...] = (y2 + x).astype(o_ref.dtype)


def _pack_weight(w_oihw, spb):
    """OIHW (C,C,3,3) -> block-diagonal tap-flattened (spb*C, 9*spb*C)."""
    O, I, KH, KW = w_oihw.shape
    w_t = jnp.transpose(w_oihw, (2, 3, 0, 1)).reshape(KH * KW, O, I)  # (9,O,I)
    eye = jnp.eye(spb, dtype=w_oihw.dtype)
    big = jnp.einsum('pq,toc->potqc', eye, w_t)           # (spb,O,9,spb,I)
    return big.reshape(spb * O, KH * KW * spb * I)


def resblock_forward(x_nchw, w1_oihw, b1, w2_oihw, b2):
    """x_nchw: (B, C, H, W) float32, PyTorch layout.  Returns (B, C, H, W)."""
    B, C, H, W = x_nchw.shape
    HW = H * W

    # Pack enough samples per block to fill the 8-row f32 sublane group.
    spb = max(1, min(B, 8 // C)) if C < 8 else 1
    while B % spb:
        spb -= 1
    R = spb * C
    n_tiles = B // spb

    xf = x_nchw.reshape(B * C, HW)          # free metadata reshape (NCHW-native)
    w1p = _pack_weight(w1_oihw, spb)
    w2p = _pack_weight(w2_oihw, spb)
    b1p = jnp.tile(b1, (spb,)).reshape(R, 1)
    b2p = jnp.tile(b2, (spb,)).reshape(R, 1)

    kernel = functools.partial(_resblock_kernel, H=H, W=W)

    out = pl.pallas_call(
        kernel,
        out_shape=jax.ShapeDtypeStruct((B * C, HW), x_nchw.dtype),
        grid_spec=pltpu.PrefetchScalarGridSpec(
            num_scalar_prefetch=0,
            grid=(n_tiles,),
            in_specs=[
                pl.BlockSpec((R, HW), lambda i: (i, 0)),
                pl.BlockSpec((R, 9 * R), lambda i: (0, 0)),
                pl.BlockSpec((R, 1), lambda i: (0, 0)),
                pl.BlockSpec((R, 9 * R), lambda i: (0, 0)),
                pl.BlockSpec((R, 1), lambda i: (0, 0)),
            ],
            out_specs=pl.BlockSpec((R, HW), lambda i: (i, 0)),
        ),
        compiler_params=pltpu.CompilerParams(
            dimension_semantics=("parallel",),
            vmem_limit_bytes=4 * 1024 * 1024,   # toy working set is ~100 KB
        ),
    )(xf, w1p, b1p, w2p, b2p)

    return out.reshape(B, C, H, W)


# ---------------- pure-JAX reference (for correctness check) ----------------
def _conv_ref(x_nchw, w_oihw, b):
    y = jax.lax.conv_general_dilated(
        x_nchw, w_oihw, window_strides=(1, 1), padding=((1, 1), (1, 1)),
        dimension_numbers=("NCHW", "OIHW", "NCHW"))
    return y + b.reshape(1, -1, 1, 1)


def _inorm_ref(y):
    m = jnp.mean(y, axis=(2, 3), keepdims=True)
    v = jnp.mean((y - m) ** 2, axis=(2, 3), keepdims=True)
    return (y - m) * jax.lax.rsqrt(v + EPS)


def resblock_reference(x, w1, b1, w2, b2):
    y = jnp.maximum(_inorm_ref(_conv_ref(x, w1, b1)), 0.0)
    y = _inorm_ref(_conv_ref(y, w2, b2))
    return y + x


if __name__ == "__main__":
    B, C, H, W = 2, 4, 16, 16
    key = jax.random.PRNGKey(0)
    kx, kw1, kb1, kw2, kb2 = jax.random.split(key, 5)

    # Deterministic synthetic parameters (PyTorch Conv2d-style uniform init).
    bound = 1.0 / math.sqrt(C * 3 * 3)
    x = jax.random.normal(kx, (B, C, H, W), dtype=jnp.float32)
    w1 = jax.random.uniform(kw1, (C, C, 3, 3), jnp.float32, -bound, bound)
    b1 = jax.random.uniform(kb1, (C,), jnp.float32, -bound, bound)
    w2 = jax.random.uniform(kw2, (C, C, 3, 3), jnp.float32, -bound, bound)
    b2 = jax.random.uniform(kb2, (C,), jnp.float32, -bound, bound)

    out = jax.block_until_ready(resblock_forward(x, w1, b1, w2, b2))
    ref = jax.block_until_ready(resblock_reference(x, w1, b1, w2, b2))

    assert out.shape == (B, C, H, W)
    err = float(jnp.max(jnp.abs(out - ref)))
    assert err < 1e-3, f"mismatch vs. JAX reference: {err}"
    print("KERNEL_OK")
</pallas_src>

<mosaic_0001>
module attributes {stable_mosaic.version = 11 : i64} {
  func.func @_resblock_kernel(%arg0: i32, %arg1: memref<8x256xf32, #tpu.memory_space<vmem>>, %arg2: memref<8x72xf32, #tpu.memory_space<vmem>>, %arg3: memref<8x1xf32, #tpu.memory_space<vmem>>, %arg4: memref<8x72xf32, #tpu.memory_space<vmem>>, %arg5: memref<8x1xf32, #tpu.memory_space<vmem>>, %arg6: memref<8x256xf32, #tpu.memory_space<vmem>>) attributes {dimension_semantics = [#tpu.dimension_semantics<parallel>], iteration_bounds = array<i64: 1>, scalar_prefetch = 0 : i64, scratch_operands = 0 : i64, tpu.core_type = #tpu.core_type<tc>, window_params = [{transform_indices = @transform_0, window_bounds = array<i64: 8, 256>}, {pipeline_mode = #tpu.pipeline_mode<synchronous>, transform_indices = @transform_1, window_bounds = array<i64: 8, 72>}, {pipeline_mode = #tpu.pipeline_mode<synchronous>, transform_indices = @transform_2, window_bounds = array<i64: 8, 1>}, {pipeline_mode = #tpu.pipeline_mode<synchronous>, transform_indices = @transform_3, window_bounds = array<i64: 8, 72>}, {pipeline_mode = #tpu.pipeline_mode<synchronous>, transform_indices = @transform_4, window_bounds = array<i64: 8, 1>}, {transform_indices = @transform_5, window_bounds = array<i64: 8, 256>}]} {
    %c0 = arith.constant 0 : index
    %c0_0 = arith.constant 0 : index
    %0 = vector.load %arg1[%c0, %c0_0] : memref<8x256xf32, #tpu.memory_space<vmem>>, vector<8x256xf32>
    %1 = tpu.iota {dimensions = array<i32: 1>} : vector<1x256xi32>
    %c15_i32 = arith.constant 15 : i32
    %2 = vector.broadcast %c15_i32 : i32 to vector<1x256xi32>
    %3 = arith.andi %1, %2 : vector<1x256xi32>
    %c16_i32 = arith.constant 16 : i32
    %4 = vector.broadcast %c16_i32 : i32 to vector<1x256xi32>
    %5 = arith.cmpi sge, %1, %4 : vector<1x256xi32>
    %c1_i32 = arith.constant 1 : i32
    %6 = vector.broadcast %c1_i32 : i32 to vector<1x256xi32>
    %7 = arith.cmpi sge, %3, %6 : vector<1x256xi32>
    %8 = arith.andi %5, %7 : vector<1x256xi1>
    %c16_i32_1 = arith.constant 16 : i32
    %9 = vector.broadcast %c16_i32_1 : i32 to vector<1x256xi32>
    %10 = arith.cmpi sge, %1, %9 : vector<1x256xi32>
    %c16_i32_2 = arith.constant 16 : i32
    %11 = vector.broadcast %c16_i32_2 : i32 to vector<1x256xi32>
    %12 = arith.cmpi sge, %1, %11 : vector<1x256xi32>
    %c15_i32_3 = arith.constant 15 : i32
    %13 = vector.broadcast %c15_i32_3 : i32 to vector<1x256xi32>
    %14 = arith.cmpi slt, %3, %13 : vector<1x256xi32>
    %15 = arith.andi %12, %14 : vector<1x256xi1>
    %c1_i32_4 = arith.constant 1 : i32
    %16 = vector.broadcast %c1_i32_4 : i32 to vector<1x256xi32>
    %17 = arith.cmpi sge, %3, %16 : vector<1x256xi32>
    %c15_i32_5 = arith.constant 15 : i32
    %18 = vector.broadcast %c15_i32_5 : i32 to vector<1x256xi32>
    %19 = arith.cmpi slt, %3, %18 : vector<1x256xi32>
    %c240_i32 = arith.constant 240 : i32
    %20 = vector.broadcast %c240_i32 : i32 to vector<1x256xi32>
    %21 = arith.cmpi slt, %1, %20 : vector<1x256xi32>
    %c1_i32_6 = arith.constant 1 : i32
    %22 = vector.broadcast %c1_i32_6 : i32 to vector<1x256xi32>
    %23 = arith.cmpi sge, %3, %22 : vector<1x256xi32>
    %24 = arith.andi %21, %23 : vector<1x256xi1>
    %c240_i32_7 = arith.constant 240 : i32
    %25 = vector.broadcast %c240_i32_7 : i32 to vector<1x256xi32>
    %26 = arith.cmpi slt, %1, %25 : vector<1x256xi32>
    %c240_i32_8 = arith.constant 240 : i32
    %27 = vector.broadcast %c240_i32_8 : i32 to vector<1x256xi32>
    %28 = arith.cmpi slt, %1, %27 : vector<1x256xi32>
    %c15_i32_9 = arith.constant 15 : i32
    %29 = vector.broadcast %c15_i32_9 : i32 to vector<1x256xi32>
    %30 = arith.cmpi slt, %3, %29 : vector<1x256xi32>
    %31 = arith.andi %28, %30 : vector<1x256xi1>
    %c17_i32 = arith.constant 17 : i32
    %32 = tpu.dynamic_rotate %0 by %c17_i32 dim 1 : vector<8x256xf32>, i32 -> vector<8x256xf32>
    %cst = arith.constant 0.000000e+00 : f32
    %33 = vector.shape_cast %8 : vector<1x256xi1> to vector<1x256xi1>
    %34 = vector.broadcast %33 : vector<1x256xi1> to vector<8x256xi1>
    %35 = vector.broadcast %cst : f32 to vector<8x256xf32>
    %36 = arith.select %34, %32, %35 : vector<8x256xi1>, vector<8x256xf32>
    %c16_i32_10 = arith.constant 16 : i32
    %37 = tpu.dynamic_rotate %0 by %c16_i32_10 dim 1 : vector<8x256xf32>, i32 -> vector<8x256xf32>
    %cst_11 = arith.constant 0.000000e+00 : f32
    %38 = vector.shape_cast %10 : vector<1x256xi1> to vector<1x256xi1>
    %39 = vector.broadcast %38 : vector<1x256xi1> to vector<8x256xi1>
    %40 = vector.broadcast %cst_11 : f32 to vector<8x256xf32>
    %41 = arith.select %39, %37, %40 : vector<8x256xi1>, vector<8x256xf32>
    %c15_i32_12 = arith.constant 15 : i32
    %42 = tpu.dynamic_rotate %0 by %c15_i32_12 dim 1 : vector<8x256xf32>, i32 -> vector<8x256xf32>
    %cst_13 = arith.constant 0.000000e+00 : f32
    %43 = vector.shape_cast %15 : vector<1x256xi1> to vector<1x256xi1>
    %44 = vector.broadcast %43 : vector<1x256xi1> to vector<8x256xi1>
    %45 = vector.broadcast %cst_13 : f32 to vector<8x256xf32>
    %46 = arith.select %44, %42, %45 : vector<8x256xi1>, vector<8x256xf32>
    %c1_i32_14 = arith.constant 1 : i32
    %47 = tpu.dynamic_rotate %0 by %c1_i32_14 dim 1 : vector<8x256xf32>, i32 -> vector<8x256xf32>
    %cst_15 = arith.constant 0.000000e+00 : f32
    %48 = vector.shape_cast %17 : vector<1x256xi1> to vector<1x256xi1>
    %49 = vector.broadcast %48 : vector<1x256xi1> to vector<8x256xi1>
    %50 = vector.broadcast %cst_15 : f32 to vector<8x256xf32>
    %51 = arith.select %49, %47, %50 : vector<8x256xi1>, vector<8x256xf32>
    %c255_i32 = arith.constant 255 : i32
    %52 = tpu.dynamic_rotate %0 by %c255_i32 dim 1 : vector<8x256xf32>, i32 -> vector<8x256xf32>
    %cst_16 = arith.constant 0.000000e+00 : f32
    %53 = vector.shape_cast %19 : vector<1x256xi1> to vector<1x256xi1>
    %54 = vector.broadcast %53 : vector<1x256xi1> to vector<8x256xi1>
    %55 = vector.broadcast %cst_16 : f32 to vector<8x256xf32>
    %56 = arith.select %54, %52, %55 : vector<8x256xi1>, vector<8x256xf32>
    %c241_i32 = arith.constant 241 : i32
    %57 = tpu.dynamic_rotate %0 by %c241_i32 dim 1 : vector<8x256xf32>, i32 -> vector<8x256xf32>
    %cst_17 = arith.constant 0.000000e+00 : f32
    %58 = vector.shape_cast %24 : vector<1x256xi1> to vector<1x256xi1>
    %59 = vector.broadcast %58 : vector<1x256xi1> to vector<8x256xi1>
    %60 = vector.broadcast %cst_17 : f32 to vector<8x256xf32>
    %61 = arith.select %59, %57, %60 : vector<8x256xi1>, vector<8x256xf32>
    %c240_i32_18 = arith.constant 240 : i32
    %62 = tpu.dynamic_rotate %0 by %c240_i32_18 dim 1 : vector<8x256xf32>, i32 -> vector<8x256xf32>
    %cst_19 = arith.constant 0.000000e+00 : f32
    %63 = vector.shape_cast %26 : vector<1x256xi1> to vector<1x256xi1>
    %64 = vector.broadcast %63 : vector<1x256xi1> to vector<8x256xi1>
    %65 = vector.broadcast %cst_19 : f32 to vector<8x256xf32>
    %66 = arith.select %64, %62, %65 : vector<8x256xi1>, vector<8x256xf32>
    %c239_i32 = arith.constant 239 : i32
    %67 = tpu.dynamic_rotate %0 by %c239_i32 dim 1 : vector<8x256xf32>, i32 -> vector<8x256xf32>
    %cst_20 = arith.constant 0.000000e+00 : f32
    %68 = vector.shape_cast %31 : vector<1x256xi1> to vector<1x256xi1>
    %69 = vector.broadcast %68 : vector<1x256xi1> to vector<8x256xi1>
    %70 = vector.broadcast %cst_20 : f32 to vector<8x256xf32>
    %71 = arith.select %69, %67, %70 : vector<8x256xi1>, vector<8x256xf32>
    %72 = tpu.concatenate %36, %41, %46, %51, %0, %56, %61, %66, %71 in 0 : vector<8x256xf32>, vector<8x256xf32>, vector<8x256xf32>, vector<8x256xf32>, vector<8x256xf32>, vector<8x256xf32>, vector<8x256xf32>, vector<8x256xf32>, vector<8x256xf32> -> vector<72x256xf32>
    %c0_21 = arith.constant 0 : index
    %c0_22 = arith.constant 0 : index
    %73 = vector.load %arg2[%c0_21, %c0_22] : memref<8x72xf32, #tpu.memory_space<vmem>>, vector<8x72xf32>
    %cst_23 = arith.constant dense<0.000000e+00> : vector<8x256xf32>
    %74 = tpu.matmul %73, %72, %cst_23 {dimension_numbers = #tpu.dot_dimension_numbers<[1], [0], [0], [1], [0, 0, 1, 1], [], []>} : vector<8x72xf32>, vector<72x256xf32>, vector<8x256xf32> -> vector<8x256xf32>
    %c0_24 = arith.constant 0 : index
    %c0_25 = arith.constant 0 : index
    %75 = vector.load %arg3[%c0_24, %c0_25] : memref<8x1xf32, #tpu.memory_space<vmem>>, vector<8x1xf32>
    %76 = vector.broadcast %75 : vector<8x1xf32> to vector<8x256xf32>
    %77 = arith.addf %74, %76 : vector<8x256xf32>
    %cst_26 = arith.constant dense<0.000000e+00> : vector<8xf32>
    %78 = vector.multi_reduction <add>, %77, %cst_26 [1] : vector<8x256xf32> to vector<8xf32>
    %79 = vector.shape_cast %78 : vector<8xf32> to vector<8x1xf32>
    %cst_27 = arith.constant 2.560000e+02 : f32
    %80 = vector.broadcast %cst_27 : f32 to vector<8x1xf32>
    %81 = arith.divf %79, %80 : vector<8x1xf32>
    %82 = arith.mulf %77, %77 : vector<8x256xf32>
    %cst_28 = arith.constant dense<0.000000e+00> : vector<8xf32>
    %83 = vector.multi_reduction <add>, %82, %cst_28 [1] : vector<8x256xf32> to vector<8xf32>
    %84 = vector.shape_cast %83 : vector<8xf32> to vector<8x1xf32>
    %cst_29 = arith.constant 2.560000e+02 : f32
    %85 = vector.broadcast %cst_29 : f32 to vector<8x1xf32>
    %86 = arith.divf %84, %85 : vector<8x1xf32>
    %87 = arith.mulf %81, %81 : vector<8x1xf32>
    %88 = arith.subf %86, %87 : vector<8x1xf32>
    %89 = vector.broadcast %81 : vector<8x1xf32> to vector<8x256xf32>
    %90 = arith.subf %77, %89 : vector<8x256xf32>
    %cst_30 = arith.constant 9.99999974E-6 : f32
    %91 = vector.broadcast %cst_30 : f32 to vector<8x1xf32>
    %92 = arith.addf %88, %91 : vector<8x1xf32>
    %93 = math.rsqrt %92 : vector<8x1xf32>
    %94 = vector.broadcast %93 : vector<8x1xf32> to vector<8x256xf32>
    %95 = arith.mulf %90, %94 : vector<8x256xf32>
    %cst_31 = arith.constant 0.000000e+00 : f32
    %96 = vector.broadcast %cst_31 : f32 to vector<8x256xf32>
    %97 = arith.maximumf %95, %96 : vector<8x256xf32>
    %c17_i32_32 = arith.constant 17 : i32
    %98 = tpu.dynamic_rotate %97 by %c17_i32_32 dim 1 : vector<8x256xf32>, i32 -> vector<8x256xf32>
    %cst_33 = arith.constant 0.000000e+00 : f32
    %99 = vector.shape_cast %8 : vector<1x256xi1> to vector<1x256xi1>
    %100 = vector.broadcast %99 : vector<1x256xi1> to vector<8x256xi1>
    %101 = vector.broadcast %cst_33 : f32 to vector<8x256xf32>
    %102 = arith.select %100, %98, %101 : vector<8x256xi1>, vector<8x256xf32>
    %c16_i32_34 = arith.constant 16 : i32
    %103 = tpu.dynamic_rotate %97 by %c16_i32_34 dim 1 : vector<8x256xf32>, i32 -> vector<8x256xf32>
    %cst_35 = arith.constant 0.000000e+00 : f32
    %104 = vector.shape_cast %10 : vector<1x256xi1> to vector<1x256xi1>
    %105 = vector.broadcast %104 : vector<1x256xi1> to vector<8x256xi1>
    %106 = vector.broadcast %cst_35 : f32 to vector<8x256xf32>
    %107 = arith.select %105, %103, %106 : vector<8x256xi1>, vector<8x256xf32>
    %c15_i32_36 = arith.constant 15 : i32
    %108 = tpu.dynamic_rotate %97 by %c15_i32_36 dim 1 : vector<8x256xf32>, i32 -> vector<8x256xf32>
    %cst_37 = arith.constant 0.000000e+00 : f32
    %109 = vector.shape_cast %15 : vector<1x256xi1> to vector<1x256xi1>
    %110 = vector.broadcast %109 : vector<1x256xi1> to vector<8x256xi1>
    %111 = vector.broadcast %cst_37 : f32 to vector<8x256xf32>
    %112 = arith.select %110, %108, %111 : vector<8x256xi1>, vector<8x256xf32>
    %c1_i32_38 = arith.constant 1 : i32
    %113 = tpu.dynamic_rotate %97 by %c1_i32_38 dim 1 : vector<8x256xf32>, i32 -> vector<8x256xf32>
    %cst_39 = arith.constant 0.000000e+00 : f32
    %114 = vector.shape_cast %17 : vector<1x256xi1> to vector<1x256xi1>
    %115 = vector.broadcast %114 : vector<1x256xi1> to vector<8x256xi1>
    %116 = vector.broadcast %cst_39 : f32 to vector<8x256xf32>
    %117 = arith.select %115, %113, %116 : vector<8x256xi1>, vector<8x256xf32>
    %c255_i32_40 = arith.constant 255 : i32
    %118 = tpu.dynamic_rotate %97 by %c255_i32_40 dim 1 : vector<8x256xf32>, i32 -> vector<8x256xf32>
    %cst_41 = arith.constant 0.000000e+00 : f32
    %119 = vector.shape_cast %19 : vector<1x256xi1> to vector<1x256xi1>
    %120 = vector.broadcast %119 : vector<1x256xi1> to vector<8x256xi1>
    %121 = vector.broadcast %cst_41 : f32 to vector<8x256xf32>
    %122 = arith.select %120, %118, %121 : vector<8x256xi1>, vector<8x256xf32>
    %c241_i32_42 = arith.constant 241 : i32
    %123 = tpu.dynamic_rotate %97 by %c241_i32_42 dim 1 : vector<8x256xf32>, i32 -> vector<8x256xf32>
    %cst_43 = arith.constant 0.000000e+00 : f32
    %124 = vector.shape_cast %24 : vector<1x256xi1> to vector<1x256xi1>
    %125 = vector.broadcast %124 : vector<1x256xi1> to vector<8x256xi1>
    %126 = vector.broadcast %cst_43 : f32 to vector<8x256xf32>
    %127 = arith.select %125, %123, %126 : vector<8x256xi1>, vector<8x256xf32>
    %c240_i32_44 = arith.constant 240 : i32
    %128 = tpu.dynamic_rotate %97 by %c240_i32_44 dim 1 : vector<8x256xf32>, i32 -> vector<8x256xf32>
    %cst_45 = arith.constant 0.000000e+00 : f32
    %129 = vector.shape_cast %26 : vector<1x256xi1> to vector<1x256xi1>
    %130 = vector.broadcast %129 : vector<1x256xi1> to vector<8x256xi1>
    %131 = vector.broadcast %cst_45 : f32 to vector<8x256xf32>
    %132 = arith.select %130, %128, %131 : vector<8x256xi1>, vector<8x256xf32>
    %c239_i32_46 = arith.constant 239 : i32
    %133 = tpu.dynamic_rotate %97 by %c239_i32_46 dim 1 : vector<8x256xf32>, i32 -> vector<8x256xf32>
    %cst_47 = arith.constant 0.000000e+00 : f32
    %134 = vector.shape_cast %31 : vector<1x256xi1> to vector<1x256xi1>
    %135 = vector.broadcast %134 : vector<1x256xi1> to vector<8x256xi1>
    %136 = vector.broadcast %cst_47 : f32 to vector<8x256xf32>
    %137 = arith.select %135, %133, %136 : vector<8x256xi1>, vector<8x256xf32>
    %138 = tpu.concatenate %102, %107, %112, %117, %97, %122, %127, %132, %137 in 0 : vector<8x256xf32>, vector<8x256xf32>, vector<8x256xf32>, vector<8x256xf32>, vector<8x256xf32>, vector<8x256xf32>, vector<8x256xf32>, vector<8x256xf32>, vector<8x256xf32> -> vector<72x256xf32>
    %c0_48 = arith.constant 0 : index
    %c0_49 = arith.constant 0 : index
    %139 = vector.load %arg4[%c0_48, %c0_49] : memref<8x72xf32, #tpu.memory_space<vmem>>, vector<8x72xf32>
    %cst_50 = arith.constant dense<0.000000e+00> : vector<8x256xf32>
    %140 = tpu.matmul %139, %138, %cst_50 {dimension_numbers = #tpu.dot_dimension_numbers<[1], [0], [0], [1], [0, 0, 1, 1], [], []>} : vector<8x72xf32>, vector<72x256xf32>, vector<8x256xf32> -> vector<8x256xf32>
    %c0_51 = arith.constant 0 : index
    %c0_52 = arith.constant 0 : index
    %141 = vector.load %arg5[%c0_51, %c0_52] : memref<8x1xf32, #tpu.memory_space<vmem>>, vector<8x1xf32>
    %142 = vector.broadcast %141 : vector<8x1xf32> to vector<8x256xf32>
    %143 = arith.addf %140, %142 : vector<8x256xf32>
    %cst_53 = arith.constant dense<0.000000e+00> : vector<8xf32>
    %144 = vector.multi_reduction <add>, %143, %cst_53 [1] : vector<8x256xf32> to vector<8xf32>
    %145 = vector.shape_cast %144 : vector<8xf32> to vector<8x1xf32>
    %cst_54 = arith.constant 2.560000e+02 : f32
    %146 = vector.broadcast %cst_54 : f32 to vector<8x1xf32>
    %147 = arith.divf %145, %146 : vector<8x1xf32>
    %148 = arith.mulf %143, %143 : vector<8x256xf32>
    %cst_55 = arith.constant dense<0.000000e+00> : vector<8xf32>
    %149 = vector.multi_reduction <add>, %148, %cst_55 [1] : vector<8x256xf32> to vector<8xf32>
    %150 = vector.shape_cast %149 : vector<8xf32> to vector<8x1xf32>
    %cst_56 = arith.constant 2.560000e+02 : f32
    %151 = vector.broadcast %cst_56 : f32 to vector<8x1xf32>
    %152 = arith.divf %150, %151 : vector<8x1xf32>
    %153 = arith.mulf %147, %147 : vector<8x1xf32>
    %154 = arith.subf %152, %153 : vector<8x1xf32>
    %155 = vector.broadcast %147 : vector<8x1xf32> to vector<8x256xf32>
    %156 = arith.subf %143, %155 : vector<8x256xf32>
    %cst_57 = arith.constant 9.99999974E-6 : f32
    %157 = vector.broadcast %cst_57 : f32 to vector<8x1xf32>
    %158 = arith.addf %154, %157 : vector<8x1xf32>
    %159 = math.rsqrt %158 : vector<8x1xf32>
    %160 = vector.broadcast %159 : vector<8x1xf32> to vector<8x256xf32>
    %161 = arith.mulf %156, %160 : vector<8x256xf32>
    %162 = arith.addf %161, %0 : vector<8x256xf32>
    %c0_58 = arith.constant 0 : index
    %c0_59 = arith.constant 0 : index
    %163 = vector.load %arg6[%c0_58, %c0_59] : memref<8x256xf32, #tpu.memory_space<vmem>>, vector<8x256xf32>
    tpu.vector_store %arg6[%c0_58, %c0_59], %162 {strides = array<i32>} : memref<8x256xf32, #tpu.memory_space<vmem>>, vector<8x256xf32>,
    return
  }
  func.func @transform_0(%arg0: i32) -> (i32, i32) {
    %c0_i32 = arith.constant 0 : i32
    %c0_i32_0 = arith.constant 0 : i32
    return %arg0, %c0_i32 : i32, i32
  }
  func.func @transform_1(%arg0: i32) -> (i32, i32) {
    %c0_i32 = arith.constant 0 : i32
    %c0_i32_0 = arith.constant 0 : i32
    %c0_i32_1 = arith.constant 0 : i32
    return %c0_i32, %c0_i32_0 : i32, i32
  }
  func.func @transform_2(%arg0: i32) -> (i32, i32) {
    %c0_i32 = arith.constant 0 : i32
    %c0_i32_0 = arith.constant 0 : i32
    %c0_i32_1 = arith.constant 0 : i32
    return %c0_i32, %c0_i32_0 : i32, i32
  }
  func.func @transform_3(%arg0: i32) -> (i32, i32) {
    %c0_i32 = arith.constant 0 : i32
    %c0_i32_0 = arith.constant 0 : i32
    %c0_i32_1 = arith.constant 0 : i32
    return %c0_i32, %c0_i32_0 : i32, i32
  }
  func.func @transform_4(%arg0: i32) -> (i32, i32) {
    %c0_i32 = arith.constant 0 : i32
    %c0_i32_0 = arith.constant 0 : i32
    %c0_i32_1 = arith.constant 0 : i32
    return %c0_i32, %c0_i32_0 : i32, i32
  }
  func.func @transform_5(%arg0: i32) -> (i32, i32) {
    %c0_i32 = arith.constant 0 : i32
    %c0_i32_0 = arith.constant 0 : i32
    return %arg0, %c0_i32 : i32, i32
  }
}

</mosaic_0001>

<bundles_post_ra>
// kernel: tpu_custom_call.1
= control target key start
LH: loop header
LB: loop body
LE: loop exit
PB: predicated region body
PF: predicated region fallthrough
CT: control target
= control target key end

     0   :  { %10 = vsyncpa [#allocation3], 0  ;;  %s873_s0 = inlined_call_operand.vmem [shape: f32[8,256], index: 0, kind: input, shape index: {}]   ;;  %s874_s1 = inlined_call_operand.hbm [shape: f32[8,72], index: 1, kind: input, shape index: {}]   ;;  %s875_s2 = inlined_call_operand.vmem [shape: f32[8,1], index: 2, kind: input, shape index: {}]   ;;  %s876_s3 = inlined_call_operand.hbm [shape: f32[8,72], index: 3, kind: input, shape index: {}]   ;;  %s877_s4 = inlined_call_operand.vmem [shape: f32[8,1], index: 4, kind: input, shape index: {}]   ;;  %s878_s5 = inlined_call_operand.hbm [shape: f32[8,256], index: 5, kind: output, shape index: {}]  }
   0x1   :  { %11 = vsyncpa [#allocation6], 0 }
   0x2   :  { %12 = vsyncpa [#allocation4], 0  ;;  %s20_s20 = sshll.u32 %s874_s1, 4  ;;  %s558_s21 = smov [#allocation2]   ;;  %s21_s20 = int_to_ptr.hbm [resolvable:$true] %s20_s20 }
   0x3   :  { %s22_s22 = sshll.u32 %s558_s21, 4  ;;  %s33_s25 = sshll.u32 %s876_s3, 4  ;;  %s23_s22 = int_to_ptr.vmem [resolvable:$true] %s22_s22  ;;  %s34_s25 = int_to_ptr.hbm [resolvable:$true] %s33_s25 }
   0x4   :  { %25 = dma.hbm_to_vmem [thread:$0]  %s21_s20, 128, %s23_s22, [#allocation3]  }
   0x5   :  { %s559_s26 = smov [#allocation5]  }
   0x6   :  { %s35_s27 = sshll.u32 %s559_s26, 4  ;;  %s36_s27 = int_to_ptr.vmem [resolvable:$true] %s35_s27 }
   0x7   :  { %38 = dma.hbm_to_vmem [thread:$0]  %s34_s25, 128, %s36_s27, [#allocation6]  }
   0x8   :  { %552 = dma.done.wait [#allocation3], 128  }
   0x9   :  { %553 = vsyncadd [#allocation3], 4294967168 }
   0xa   :  { %554 = dma.done.wait [#allocation6], 128  }
   0xb   :  { %555 = vsyncadd [#allocation6], 4294967168  ;;  %v610_v0 = vld [vmem:[%s873_s0] sm:$0xff]  ;;  %s560_s29 = smov 112   ;;  %s561_s3 = smov 111   ;;  %v621_v1 = vld [vmem:[%s873_s0 + $0x8] sm:$0xff]  ;;  %v51_v2 = vlaneseq }
   0xc   :  { %150 = vrot.lane.b32.xlu1 %v610_v0, %s560_s29  ;;  %163 = vrot.lane.b32.xlu0 %v610_v0, %s561_s3  ;;  %s562_s30 = smov 113   ;;  %s563_s8 = smov 127   ;;  %v177_v24 = vld [vmem:[%s875_s2] sm:$0xff]  ;;  %v568_v27 = vmov 0   ;;  %v569_v59 = vmov 256.0  }
   0xd   :  { %137 = vrot.lane.b32.xlu2 %v610_v0, %s562_s30  ;;  %s564_s9 = smov 1   ;;  %s565_s0 = smov 15   ;;  %v649_v3 = vand.u32 127, %v51_v2  ;;  %471 = vset.pattern.permute.xlu1 %v568_v27  ;;  %v176_v47 = vld [vmem:[#allocation2] sm:$0xff]  ;;  %474 = vrcp.f32 %v569_v59 }
   0xe   :  { %s566_s10 = smov 16   ;;  %s567_s11 = smov 17   ;;  %472 = vset.pattern.permute.xlu2 %v568_v27  ;;  %473 = vset.pattern.permute.xlu0 %v568_v27 }
   0xf   :  { %v652_v5 = vadd.s32 128, %v649_v3  ;;  %v54_v9 = vand.u32 15, %v649_v3  ;;  %vm167_vm2 = vcmp.lt.s32.totalorder %v649_v3, 111  ;;  %vm154_vm5 = vcmp.lt.s32.totalorder %v649_v3, 112  ;;  %s415_s18 = sshll.u32 %s878_s5, 4  ;;  %s416_s18 = int_to_ptr.hbm [resolvable:$true] %s415_s18 }
  0x10   :  { %vm141_vm7 = vcmp.lt.s32.totalorder %v649_v3, 113  ;;  %vm881_vm10 = vcmp.lt.s32.totalorder %v649_v3, 127  ;;  %vm880_vm11 = vcmp.lt.s32.totalorder %v649_v3, 1  ;;  %vm884_vm12 = vcmp.ge.s32.totalorder %v649_v3, 16 }
  0x11   :  { %v55_v8 = vand.u32 15, %v652_v5  ;;  %vm67_vm1 = vcmp.lt.s32.totalorder %v652_v5, 240  ;;  %vm662_vm3 = vcmp.lt.s32.totalorder %v54_v9, 15  ;;  %vm692_vm8 = vcmp.ge.s32.totalorder %v54_v9, 1 }
  0x12   :  { %vm879_vm13 = vcmp.lt.s32.totalorder %v649_v3, 15  ;;  %vm739_vm14 = vmand %vm884_vm12, %vm662_vm3  ;;  %vm89_vm15 = vcmp.lt.s32.totalorder %v649_v3, 16 }
  0x13   :  { %vm656_vm0 = vcmp.lt.s32.totalorder %v55_v8, 15  ;;  %vm675_vm6 = vcmp.ge.s32.totalorder %v55_v8, 1  ;;  %v475_v60 = vpop.eup %474 }
  0x14   :  { %152 = vrot.lane.b32.xlu1 %v621_v1, %s560_s29  ;;  %165 = vrot.lane.b32.xlu0 %v621_v1, %s561_s3  ;;  %vm670_vm4 = vmand %vm67_vm1, %vm656_vm0  ;;  %v231_v61 = vmul.f32 256.0, %v475_v60 }
  0x15   :  { %139 = vrot.lane.b32.xlu2 %v621_v1, %s562_s30  ;;  %vm700_vm9 = vmand %vm67_vm1, %vm675_vm6 }
  0x16   :  { %v232_v62 = vsub.f32 1.0, %v231_v61 }
  0x18   :  { %v233_v63 = vmul.f32 %v475_v60, %v232_v62 }
  0x1a   :  { %v234_v2 = vadd.f32 %v475_v60, %v233_v63 }
  0x1c   :  { %126 = vrot.lane.b32.xlu1 %v621_v1, %s563_s8  ;;  %124 = vrot.lane.b32.xlu0 %v610_v0, %s563_s8 }
  0x1d   :  { %111 = vrot.lane.b32.xlu2 %v610_v0, %s564_s9 }
  0x24   :  { %98 = vrot.lane.b32.xlu1 %v610_v0, %s565_s0  ;;  %113 = vrot.lane.b32.xlu0 %v621_v1, %s564_s9 }
  0x25   :  { %100 = vrot.lane.b32.xlu2 %v621_v1, %s565_s0 }
  0x2c   :  { %87 = vrot.lane.b32.xlu1 %v621_v1, %s566_s10  ;;  %85 = vrot.lane.b32.xlu0 %v610_v0, %s566_s10 }
  0x2d   :  { %72 = vrot.lane.b32.xlu2 %v610_v0, %s567_s11 }
  0x34   :  { %74 = vrot.lane.b32.xlu0 %v621_v1, %s567_s11  ;;  %180 = vperm.xlu1 %471, %v177_v24  }
  0x67   :  { %v138_v4 = vpop.permute.xlu2 %137 }
  0x6f   :  { %v140_v10 = vpop.permute.xlu2 %139 }
  0x70   :  { %v142_v25 = vsel %vm141_vm7, %v138_v4, %v140_v10  ;;  %v143_v26 = vsel %vm141_vm7, %v140_v10, %v138_v4 }
  0x77   :  { %v112_v23 = vpop.permute.xlu2 %111 }
  0x7e   :  { %v151_v6 = vpop.permute.xlu1 %150  ;;  %v164_v7 = vpop.permute.xlu0 %163 }
  0x7f   :  { %v101_v32 = vpop.permute.xlu2 %100 }
  0x86   :  { %v153_v14 = vpop.permute.xlu1 %152  ;;  %v166_v15 = vpop.permute.xlu0 %165 }
  0x87   :  { %v168_v17 = vsel %vm167_vm2, %v164_v7, %v166_v15  ;;  %v169_v18 = vsel %vm167_vm2, %v166_v15, %v164_v7  ;;  %v155_v19 = vsel %vm154_vm5, %v151_v6, %v153_v14  ;;  %v156_v20 = vsel %vm154_vm5, %v153_v14, %v151_v6  ;;  %v73_v44 = vpop.permute.xlu2 %72 }
  0x88   :  { %426 = vmatpush.msk.msra.mxu0 %vm662_vm3, %v168_v17  ;;  %434 = vmatpush.msk.msra.mxu1 %vm670_vm4, %v169_v18 }
  0x8a   :  { %195 = vmatpush.msra.mxu0 %v155_v19  ;;  %435 = vmatpush.msk.msra.mxu1 %vm67_vm1, %v156_v20 }
  0x8c   :  { %427 = vmatpush.msk.msra.mxu0 %vm692_vm8, %v142_v25  ;;  %436 = vmatpush.msk.msra.mxu1 %vm700_vm9, %v143_v26 }
  0x8e   :  { %v127_v28 = vpop.permute.xlu1 %126  ;;  %v125_v29 = vpop.permute.xlu0 %124 }
  0x8f   :  { %v129_v30 = vsel %vm881_vm10, %v125_v29, %v127_v28  ;;  %v130_v31 = vsel %vm881_vm10, %v127_v28, %v125_v29  ;;  %vm883_vm10 = vcmask 588800  }
  0x90   :  { %428 = vmatpush.msk.msra.mxu0 %vm662_vm3, %v129_v30  ;;  %437 = vmatpush.msk.msra.mxu1 %vm656_vm0, %v130_v31 }
  0x92   :  { %198 = vmatpush.msra.mxu0 %v610_v0  ;;  %218 = vmatpush.msra.mxu1 %v621_v1 }
  0x96   :  { %v99_v33 = vpop.permute.xlu1 %98  ;;  %v114_v34 = vpop.permute.xlu0 %113 }
  0x97   :  { %v117_v35 = vsel %vm880_vm11, %v114_v34, %v112_v23  ;;  %v116_v36 = vsel %vm880_vm11, %v112_v23, %v114_v34  ;;  %v104_v38 = vsel %vm879_vm13, %v101_v32, %v99_v33  ;;  %v103_v39 = vsel %vm879_vm13, %v99_v33, %v101_v32  ;;  %vm767_vm11 = vmand %vm884_vm12, %vm692_vm8 }
  0x98   :  { %429 = vmatpush.msk.msra.mxu0 %vm692_vm8, %v117_v35  ;;  %438 = vmatpush.msk.msra.mxu1 %vm675_vm6, %v116_v36  ;;  %vm882_vm13 = vcmp.lt.s32.totalorder %v649_v3, 17 }
  0x9a   :  { %430 = vmatpush.msk.msra.mxu0 %vm739_vm14, %v104_v38  ;;  %439 = vmatpush.msk.msra.mxu1 %vm656_vm0, %v103_v39 }
  0x9e   :  { %v88_v40 = vpop.permute.xlu1 %87  ;;  %v86_v41 = vpop.permute.xlu0 %85 }
  0x9f   :  { %v91_v42 = vsel %vm89_vm15, %v88_v40, %v86_v41  ;;  %v90_v43 = vsel %vm89_vm15, %v86_v41, %v88_v40 }
  0xa0   :  { %431 = vmatpush.msk.msra.mxu0 %vm884_vm12, %v91_v42  ;;  %221 = vmatpush.msra.mxu1 %v90_v43 }
  0xa6   :  { %v75_v46 = vpop.permute.xlu0 %74  ;;  %v181_v50 = vpop.permute.xlu1 %180 }
  0xa7   :  { %v78_v48 = vsel %vm882_vm13, %v75_v46, %v73_v44  ;;  %v77_v49 = vsel %vm882_vm13, %v73_v44, %v75_v46  ;;  %vm235_vm13 = vweird.f32 %v475_v60 }
  0xa8   :  { %432 = vmatpush.msk.msra.mxu0 %vm767_vm11, %v78_v48  ;;  %440 = vmatpush.msk.msra.mxu1 %vm675_vm6, %v77_v49  ;;  %v781_v4 = vsel %vm235_vm13, %v475_v60, %v234_v2  ;;  %v328_v48 = vld [vmem:[%s877_s4] sm:$0xff]  ;;  %v327_v60 = vld [vmem:[#allocation5] sm:$0xff]  ;;  %s570_s4 = smov [#allocation7]  }
  0xa9   :  { %433 = vmatmul.msk.f32.vlgmr.msra.gmra.mxu0 %vm883_vm10, %v176_v47  ;;  %441 = vmatmul.msk.f32.vlgmr.msra.gmra.mxu1 %vm883_vm10, %v176_v47  ;;  %s413_s15 = sshll.u32 %s570_s4, 4  ;;  %s414_s15 = int_to_ptr.vmem [resolvable:$true] %s413_s15 }
 0x126   :  { %v204_v51 = vpop.f32.mrf.mxu0  ;;  %v224_v52 = vpop.f32.mrf.mxu1 }
 0x127   :  { %v205_v53 = vadd.f32 %v204_v51, %v181_v50  ;;  %v225_v54 = vadd.f32 %v224_v52, %v181_v50 }
 0x129   :  { %v227_v55 = vadd.f32 %v225_v54, %v205_v53  ;;  %v238_v56 = vmul.f32 %v205_v53, %v205_v53  ;;  %v239_v57 = vmul.f32 %v225_v54, %v225_v54 }
 0x12b   :  { %228 = vadd.xlane.f32.xlu2 %v227_v55  ;;  %v240_v58 = vadd.f32 %v239_v57, %v238_v56 }
 0x12d   :  { %241 = vadd.xlane.f32.xlu0 %v240_v58 }
 0x19e   :  { %v229_v6 = vpop.xlane.xlu2 %228 }
 0x19f   :  { %v237_v7 = vmul.f32 %v781_v4, %v229_v6 }
 0x1a0   :  { %v242_v8 = vpop.xlane.xlu0 %241 }
 0x1a1   :  { %v243_v9 = vmul.f32 %v242_v8, %v781_v4  ;;  %v244_v10 = vmul.f32 %v237_v7, %v237_v7  ;;  %v246_v25 = vsub.f32 %v205_v53, %v237_v7  ;;  %v247_v26 = vsub.f32 %v225_v54, %v237_v7 }
 0x1a3   :  { %v245_v14 = vsub.f32 %v243_v9, %v244_v10 }
 0x1a5   :  { %v248_v15 = vadd.f32 1e-05, %v245_v14 }
 0x1a7   :  { %476 = vrsqrt.f32 %v248_v15  ;;  %vm255_vm12 = vweird.f32 %v248_v15 }
 0x1ad   :  { %v477_v17 = vpop.eup %476 }
 0x1ae   :  { %v250_v18 = vmul.f32 %v477_v17, %v248_v15  ;;  %vm256_vm10 = vweird.f32 %v477_v17 }
 0x1af   :  { %vm257_vm13 = vmor %vm255_vm12, %vm256_vm10  ;;  %vm910_vm10 = vcmask 588800  }
 0x1b0   :  { %v251_v19 = vmul.f32 %v477_v17, %v250_v18  ;;  %vm911_vm12 = vmmov %vm910_vm10 }
 0x1b2   :  { %v252_v20 = vmul.f32 0.5, %v251_v19 }
 0x1b4   :  { %v253_v23 = vsub.f32 1.5, %v252_v20 }
 0x1b6   :  { %v254_v24 = vmul.f32 %v477_v17, %v253_v23 }
 0x1b8   :  { %v258_v27 = vsel %vm257_vm13, %v477_v17, %v254_v24 }
 0x1b9   :  { %v259_v28 = vmul.f32 %v258_v27, %v246_v25  ;;  %v260_v29 = vmul.f32 %v258_v27, %v247_v26 }
 0x1bb   :  { %v261_v30 = vmax.f32 %v259_v28, 0.0  ;;  %v262_v31 = vmax.f32 %v260_v29, 0.0 }
 0x1bd   :  { %297 = vrot.lane.b32.xlu0 %v262_v31, %s563_s8  ;;  %305 = vrot.lane.b32.xlu2 %v262_v31, %s562_s30 }
 0x1be   :  { %319 = vrot.lane.b32.xlu1 %v261_v30, %s561_s3 }
 0x1c5   :  { %281 = vrot.lane.b32.xlu0 %v262_v31, %s565_s0  ;;  %279 = vrot.lane.b32.xlu2 %v261_v30, %s565_s0 }
 0x1c6   :  { %321 = vrot.lane.b32.xlu1 %v262_v31, %s561_s3 }
 0x1cd   :  { %263 = vrot.lane.b32.xlu0 %v261_v30, %s567_s11  ;;  %273 = vrot.lane.b32.xlu2 %v262_v31, %s566_s10 }
 0x1ce   :  { %311 = vrot.lane.b32.xlu1 %v261_v30, %s560_s29 }
 0x1d5   :  { %331 = vperm.xlu2 %472, %v328_v48  }
 0x1d6   :  { %313 = vrot.lane.b32.xlu1 %v262_v31, %s560_s29 }
 0x1de   :  { %303 = vrot.lane.b32.xlu1 %v261_v30, %s562_s30 }
 0x1e6   :  { %295 = vrot.lane.b32.xlu1 %v261_v30, %s563_s8 }
 0x1ee   :  { %287 = vrot.lane.b32.xlu1 %v261_v30, %s564_s9 }
 0x1f6   :  { %289 = vrot.lane.b32.xlu1 %v262_v31, %s564_s9 }
 0x1fe   :  { %271 = vrot.lane.b32.xlu1 %v261_v30, %s566_s10 }
 0x206   :  { %265 = vrot.lane.b32.xlu1 %v262_v31, %s567_s11 }
 0x217   :  { %v306_v41 = vpop.permute.xlu2 %305 }
 0x21f   :  { %v280_v49 = vpop.permute.xlu2 %279 }
 0x227   :  { %v274_v55 = vpop.permute.xlu2 %273 }
 0x22f   :  { %v298_v44 = vpop.permute.xlu0 %297  ;;  %v332_v61 = vpop.permute.xlu2 %331 }
 0x230   :  { %v320_v32 = vpop.permute.xlu1 %319 }
 0x237   :  { %v282_v50 = vpop.permute.xlu0 %281 }
 0x238   :  { %v322_v33 = vpop.permute.xlu1 %321 }
 0x239   :  { %v323_v34 = vsel %vm167_vm2, %v320_v32, %v322_v33  ;;  %v324_v35 = vsel %vm167_vm2, %v322_v33, %v320_v32  ;;  %vm901_vm2 = vcmp.lt.s32.totalorder %v649_v3, 127 }
 0x23a   :  { %442 = vmatpush.msk.msra.mxu2 %vm662_vm3, %v323_v34  ;;  %450 = vmatpush.msk.msra.mxu3 %vm670_vm4, %v324_v35  ;;  %vm903_vm4 = vcmp.lt.s32.totalorder %v649_v3, 1 }
 0x23f   :  { %v264_v58 = vpop.permute.xlu0 %263 }
 0x240   :  { %v312_v36 = vpop.permute.xlu1 %311 }
 0x248   :  { %v314_v38 = vpop.permute.xlu1 %313 }
 0x249   :  { %v315_v39 = vsel %vm154_vm5, %v312_v36, %v314_v38  ;;  %v316_v40 = vsel %vm154_vm5, %v314_v38, %v312_v36  ;;  %vm904_vm5 = vmmov %vm903_vm4 }
 0x24a   :  { %345 = vmatpush.msra.mxu2 %v315_v39  ;;  %451 = vmatpush.msk.msra.mxu3 %vm67_vm1, %v316_v40  ;;  %vm902_vm1 = vmmov %vm901_vm2 }
 0x250   :  { %v304_v42 = vpop.permute.xlu1 %303 }
 0x251   :  { %v307_v43 = vsel %vm141_vm7, %v304_v42, %v306_v41  ;;  %v308_v13 = vsel %vm141_vm7, %v306_v41, %v304_v42 }
 0x252   :  { %443 = vmatpush.msk.msra.mxu2 %vm692_vm8, %v307_v43  ;;  %452 = vmatpush.msk.msra.mxu3 %vm700_vm9, %v308_v13  ;;  %vm908_vm9 = vcmp.lt.s32.totalorder %v649_v3, 17 }
 0x258   :  { %v296_v46 = vpop.permute.xlu1 %295 }
 0x259   :  { %v299_v5 = vsel %vm901_vm2, %v296_v46, %v298_v44  ;;  %v300_v47 = vsel %vm902_vm1, %v298_v44, %v296_v46 }
 0x25a   :  { %444 = vmatpush.msk.msra.mxu2 %vm662_vm3, %v299_v5  ;;  %453 = vmatpush.msk.msra.mxu3 %vm656_vm0, %v300_v47  ;;  %vm905_vm3 = vcmp.lt.s32.totalorder %v649_v3, 15 }
 0x25b   :  { %v284_v53 = vsel %vm905_vm3, %v282_v50, %v280_v49  ;;  %vm906_vm7 = vmmov %vm905_vm3 }
 0x25c   :  { %348 = vmatpush.msra.mxu2 %v261_v30  ;;  %368 = vmatpush.msra.mxu3 %v262_v31  ;;  %v283_v54 = vsel %vm906_vm7, %v280_v49, %v282_v50 }
 0x260   :  { %v288_v22 = vpop.permute.xlu1 %287 }
 0x268   :  { %v290_v51 = vpop.permute.xlu1 %289 }
 0x269   :  { %v292_v52 = vsel %vm903_vm4, %v290_v51, %v288_v22  ;;  %v291_v12 = vsel %vm904_vm5, %v288_v22, %v290_v51 }
 0x26a   :  { %445 = vmatpush.msk.msra.mxu2 %vm692_vm8, %v292_v52  ;;  %454 = vmatpush.msk.msra.mxu3 %vm675_vm6, %v291_v12  ;;  %vm907_vm8 = vcmp.ge.s32.totalorder %v649_v3, 16 }
 0x26c   :  { %446 = vmatpush.msk.msra.mxu2 %vm739_vm14, %v284_v53  ;;  %455 = vmatpush.msk.msra.mxu3 %vm656_vm0, %v283_v54  ;;  %vm909_vm0 = vmmov %vm908_vm9 }
 0x270   :  { %v272_v56 = vpop.permute.xlu1 %271 }
 0x271   :  { %v276_v21 = vsel %vm89_vm15, %v274_v55, %v272_v56  ;;  %v275_v57 = vsel %vm89_vm15, %v272_v56, %v274_v55 }
 0x272   :  { %447 = vmatpush.msk.msra.mxu2 %vm907_vm8, %v276_v21  ;;  %371 = vmatpush.msra.mxu3 %v275_v57 }
 0x278   :  { %v266_v59 = vpop.permute.xlu1 %265 }
 0x279   :  { %v268_v37 = vsel %vm908_vm9, %v266_v59, %v264_v58  ;;  %v267_v11 = vsel %vm909_vm0, %v264_v58, %v266_v59 }
 0x27a   :  { %448 = vmatpush.msk.msra.mxu2 %vm767_vm11, %v268_v37  ;;  %456 = vmatpush.msk.msra.mxu3 %vm675_vm6, %v267_v11 }
 0x27b   :  { %449 = vmatmul.msk.f32.vlgmr.msra.gmra.mxu2 %vm910_vm10, %v327_v60  ;;  %457 = vmatmul.msk.f32.vlgmr.msra.gmra.mxu3 %vm911_vm12, %v327_v60 }
 0x2fe   :  { %v354_v62 = vpop.f32.mrf.mxu2  ;;  %v374_v63 = vpop.f32.mrf.mxu3 }
 0x2ff   :  { %v355_v2 = vadd.f32 %v354_v62, %v332_v61  ;;  %v375_v6 = vadd.f32 %v374_v63, %v332_v61 }
 0x301   :  { %v377_v7 = vadd.f32 %v375_v6, %v355_v2  ;;  %v381_v8 = vmul.f32 %v355_v2, %v355_v2  ;;  %v382_v9 = vmul.f32 %v375_v6, %v375_v6 }
 0x303   :  { %378 = vadd.xlane.f32.xlu0 %v377_v7  ;;  %v383_v3 = vadd.f32 %v382_v9, %v381_v8 }
 0x305   :  { %384 = vadd.xlane.f32.xlu1 %v383_v3 }
 0x376   :  { %v379_v45 = vpop.xlane.xlu0 %378 }
 0x377   :  { %v380_v10 = vmul.f32 %v379_v45, %v781_v4 }
 0x378   :  { %v385_v16 = vpop.xlane.xlu1 %384 }
 0x379   :  { %v386_v14 = vmul.f32 %v385_v16, %v781_v4  ;;  %v387_v15 = vmul.f32 %v380_v10, %v380_v10  ;;  %v389_v27 = vsub.f32 %v355_v2, %v380_v10  ;;  %v390_v28 = vsub.f32 %v375_v6, %v380_v10 }
 0x37b   :  { %v388_v17 = vsub.f32 %v386_v14, %v387_v15 }
 0x37d   :  { %v391_v18 = vadd.f32 1e-05, %v388_v17 }
 0x37f   :  { %478 = vrsqrt.f32 %v391_v18  ;;  %vm398_vm11 = vweird.f32 %v391_v18 }
 0x385   :  { %v479_v19 = vpop.eup %478 }
 0x386   :  { %v393_v20 = vmul.f32 %v479_v19, %v391_v18  ;;  %vm399_vm6 = vweird.f32 %v479_v19 }
 0x387   :  { %vm400_vm14 = vmor %vm398_vm11, %vm399_vm6 }
 0x388   :  { %v394_v23 = vmul.f32 %v479_v19, %v393_v20 }
 0x38a   :  { %v395_v24 = vmul.f32 0.5, %v394_v23 }
 0x38c   :  { %v396_v25 = vsub.f32 1.5, %v395_v24 }
 0x38e   :  { %v397_v26 = vmul.f32 %v479_v19, %v396_v25 }
 0x390   :  { %v401_v29 = vsel %vm400_vm14, %v479_v19, %v397_v26 }
 0x391   :  { %v402_v30 = vmul.f32 %v401_v29, %v389_v27  ;;  %v403_v31 = vmul.f32 %v401_v29, %v390_v28 }
 0x393   :  { %v404_v4 = vadd.f32 %v402_v30, %v610_v0  ;;  %v405_v32 = vadd.f32 %v403_v31, %v621_v1 }
 0x395   :  { %406 = vst [vmem:[#allocation7] sm:$0xff] %v404_v4 }
 0x396   :  { %407 = vst [vmem:[#allocation7 + $0x8] sm:$0xff] %v405_v32 }
 0x397   :  { %418 = dma.vmem_to_hbm [thread:$0]  %s414_s15, 256, %s416_s18, [#allocation4]  }
 0x398   :  { %556 = dma.done.wait [#allocation4], 256  }
 0x399   :  { %557 = vsyncadd [#allocation4], 4294967040 }
 0x39a   :  { %423 = vsyncpa [#allocation3], 1 }
 0x39b   :  { %424 = vsyncpa [#allocation6], 1 }
 0x39c   :  { %425 = vsyncpa [#allocation4], 1 }

</bundles_post_ra>
